<compile_context>
chip_gen: v7x
topology: tpu7x:2x2x1
jax: 0.10.0
libtpu: 0.0.40
codegen_flags: <defaults>
</compile_context>

<pallas_src>
import functools

import jax
import jax.numpy as jnp
from jax.experimental import pallas as pl
from jax.experimental.pallas import tpu as pltpu

HIDDEN = 200          # logical hidden size (matches the PyTorch module)
HIDDEN_PAD = 256      # padded hidden: multiple of 128 lanes / MXU-friendly K
OUT_PAD = 128         # padded output lane dim (>= num_classes)
LANE = 128
SUBLANE = 8


def _round_up(x, m):
    return ((x + m - 1) // m) * m


def mlp_kernel(x_ref, w1_ref, b1_ref, w2_ref, b2_ref, o_ref):
    # fc1: (TB, Dp) @ (Dp, Hpad) + (1, Hpad)  -- f32 MXU accumulate
    h = jnp.dot(x_ref[...], w1_ref[...], preferred_element_type=jnp.float32)
    h = h + b1_ref[...]
    # ReLU
    h = jnp.maximum(h, 0.0)
    # dropout(p=0.0) == identity (folded away)
    # fc2: (TB, Hpad) @ (Hpad, Cpad) + (1, Cpad)
    out = jnp.dot(h, w2_ref[...], preferred_element_type=jnp.float32)
    out = out + b2_ref[...]
    o_ref[...] = out.astype(o_ref.dtype)


@functools.partial(jax.jit, static_argnames=("block_b",))
def mlp_forward(x, w1, b1, w2, b2, *, block_b=256):
    """x: (B, D); w1: (D, 200); b1: (200,); w2: (200, C); b2: (C,)."""
    B, D = x.shape
    H = w1.shape[1]
    C = w2.shape[1]
    assert H == HIDDEN
    assert C <= OUT_PAD

    dt = x.dtype

    # --- pad operands to lane-dense / MXU-friendly shapes (exact math) ------
    Dp = _round_up(D, LANE)
    w1p = jnp.zeros((Dp, HIDDEN_PAD), dt).at[:D, :H].set(w1)
    b1p = jnp.zeros((1, HIDDEN_PAD), dt).at[0, :H].set(b1)
    w2p = jnp.zeros((HIDDEN_PAD, OUT_PAD), dt).at[:H, :C].set(w2)
    b2p = jnp.zeros((1, OUT_PAD), dt).at[0, :C].set(b2)

    # --- pad batch to a multiple of the batch tile --------------------------
    tb = min(block_b, _round_up(B, SUBLANE))
    tb = _round_up(tb, SUBLANE)
    Bp = _round_up(B, tb)
    if Bp == B and Dp == D:
        xp = x
    else:
        xp = jnp.zeros((Bp, Dp), dt).at[:B, :D].set(x)

    grid = (Bp // tb,)

    out_padded = pl.pallas_call(
        mlp_kernel,
        out_shape=jax.ShapeDtypeStruct((Bp, OUT_PAD), dt),
        grid_spec=pltpu.PrefetchScalarGridSpec(
            num_scalar_prefetch=0,
            grid=grid,
            in_specs=[
                pl.BlockSpec((tb, Dp), lambda i: (i, 0)),               # x tile
                pl.BlockSpec((Dp, HIDDEN_PAD), lambda i: (0, 0)),       # W1 (resident)
                pl.BlockSpec((1, HIDDEN_PAD), lambda i: (0, 0)),        # b1 (resident)
                pl.BlockSpec((HIDDEN_PAD, OUT_PAD), lambda i: (0, 0)),  # W2 (resident)
                pl.BlockSpec((1, OUT_PAD), lambda i: (0, 0)),           # b2 (resident)
            ],
            out_specs=pl.BlockSpec((tb, OUT_PAD), lambda i: (i, 0)),
        ),
        compiler_params=pltpu.CompilerParams(
            # batch axis is independent -> shards across the 2 TCs on v7x
            dimension_semantics=("parallel",)),
    )(xp, w1p, b1p, w2p, b2p)

    # strip batch + lane padding
    return out_padded[:B, :C]


def init_params(key, input_dim, hidden=HIDDEN, num_classes=10,
                dtype=jnp.float32):
    # PyTorch nn.Linear-style uniform init; weights stored transposed
    # (y = x @ W + b) relative to torch's (out, in) layout.
    k1, k2, k3, k4 = jax.random.split(key, 4)
    bound1 = 1.0 / (input_dim ** 0.5)
    bound2 = 1.0 / (hidden ** 0.5)
    w1 = jax.random.uniform(k1, (input_dim, hidden), dtype, -bound1, bound1)
    b1 = jax.random.uniform(k2, (hidden,), dtype, -bound1, bound1)
    w2 = jax.random.uniform(k3, (hidden, num_classes), dtype, -bound2, bound2)
    b2 = jax.random.uniform(k4, (num_classes,), dtype, -bound2, bound2)
    return w1, b1, w2, b2


if __name__ == "__main__":
    key = jax.random.PRNGKey(0)
    kx, kp = jax.random.split(key)

    batch = 8
    input_dim = 32
    num_classes = 10

    x = jax.random.normal(kx, (batch, input_dim), jnp.float32)
    w1, b1, w2, b2 = init_params(kp, input_dim, hidden=HIDDEN,
                                 num_classes=num_classes)

    out = mlp_forward(x, w1, b1, w2, b2)
    jax.block_until_ready(out)

    # Reference check in plain JAX (same math).
    ref = jnp.maximum(x @ w1 + b1[None, :], 0.0) @ w2 + b2[None, :]
    assert out.shape == (batch, num_classes)
    assert jnp.allclose(out, ref, atol=1e-4, rtol=1e-4)

    print("KERNEL_OK")
</pallas_src>

<mosaic_0001>
module attributes {stable_mosaic.version = 11 : i64} {
  func.func @mlp_kernel(%arg0: i32, %arg1: memref<8x128xf32, #tpu.memory_space<vmem>>, %arg2: memref<128x256xf32, #tpu.memory_space<vmem>>, %arg3: memref<1x256xf32, #tpu.memory_space<vmem>>, %arg4: memref<256x128xf32, #tpu.memory_space<vmem>>, %arg5: memref<1x128xf32, #tpu.memory_space<vmem>>, %arg6: memref<8x128xf32, #tpu.memory_space<vmem>>) attributes {dimension_semantics = [#tpu.dimension_semantics<parallel>], iteration_bounds = array<i64: 1>, scalar_prefetch = 0 : i64, scratch_operands = 0 : i64, tpu.core_type = #tpu.core_type<tc>, window_params = [{transform_indices = @transform_0, window_bounds = array<i64: 8, 128>}, {pipeline_mode = #tpu.pipeline_mode<synchronous>, transform_indices = @transform_1, window_bounds = array<i64: 128, 256>}, {pipeline_mode = #tpu.pipeline_mode<synchronous>, transform_indices = @transform_2, window_bounds = array<i64: 1, 256>}, {pipeline_mode = #tpu.pipeline_mode<synchronous>, transform_indices = @transform_3, window_bounds = array<i64: 256, 128>}, {pipeline_mode = #tpu.pipeline_mode<synchronous>, transform_indices = @transform_4, window_bounds = array<i64: 1, 128>}, {transform_indices = @transform_5, window_bounds = array<i64: 8, 128>}]} {
    %c0 = arith.constant 0 : index
    %c0_0 = arith.constant 0 : index
    %0 = vector.load %arg1[%c0, %c0_0] : memref<8x128xf32, #tpu.memory_space<vmem>>, vector<8x128xf32>
    %c0_1 = arith.constant 0 : index
    %c0_2 = arith.constant 0 : index
    %1 = vector.load %arg2[%c0_1, %c0_2] : memref<128x256xf32, #tpu.memory_space<vmem>>, vector<128x256xf32>
    %cst = arith.constant dense<0.000000e+00> : vector<8x256xf32>
    %2 = tpu.matmul %0, %1, %cst {dimension_numbers = #tpu.dot_dimension_numbers<[1], [0], [0], [1], [0, 0, 1, 1], [], []>} : vector<8x128xf32>, vector<128x256xf32>, vector<8x256xf32> -> vector<8x256xf32>
    %c0_3 = arith.constant 0 : index
    %c0_4 = arith.constant 0 : index
    %3 = vector.load %arg3[%c0_3, %c0_4] : memref<1x256xf32, #tpu.memory_space<vmem>>, vector<1x256xf32>
    %4 = vector.broadcast %3 : vector<1x256xf32> to vector<8x256xf32>
    %5 = arith.addf %2, %4 : vector<8x256xf32>
    %cst_5 = arith.constant 0.000000e+00 : f32
    %6 = vector.broadcast %cst_5 : f32 to vector<8x256xf32>
    %7 = arith.maximumf %5, %6 : vector<8x256xf32>
    %c0_6 = arith.constant 0 : index
    %c0_7 = arith.constant 0 : index
    %8 = vector.load %arg4[%c0_6, %c0_7] : memref<256x128xf32, #tpu.memory_space<vmem>>, vector<256x128xf32>
    %cst_8 = arith.constant dense<0.000000e+00> : vector<8x128xf32>
    %9 = tpu.matmul %7, %8, %cst_8 {dimension_numbers = #tpu.dot_dimension_numbers<[1], [0], [0], [1], [0, 0, 1, 1], [], []>} : vector<8x256xf32>, vector<256x128xf32>, vector<8x128xf32> -> vector<8x128xf32>
    %c0_9 = arith.constant 0 : index
    %c0_10 = arith.constant 0 : index
    %10 = vector.load %arg5[%c0_9, %c0_10] : memref<1x128xf32, #tpu.memory_space<vmem>>, vector<1x128xf32>
    %11 = vector.broadcast %10 : vector<1x128xf32> to vector<8x128xf32>
    %12 = arith.addf %9, %11 : vector<8x128xf32>
    %c0_11 = arith.constant 0 : index
    %c0_12 = arith.constant 0 : index
    %13 = vector.load %arg6[%c0_11, %c0_12] : memref<8x128xf32, #tpu.memory_space<vmem>>, vector<8x128xf32>
    tpu.vector_store %arg6[%c0_11, %c0_12], %12 {strides = array<i32>} : memref<8x128xf32, #tpu.memory_space<vmem>>, vector<8x128xf32>,
    return
  }
  func.func @transform_0(%arg0: i32) -> (i32, i32) {
    %c0_i32 = arith.constant 0 : i32
    %c0_i32_0 = arith.constant 0 : i32
    return %arg0, %c0_i32 : i32, i32
  }
  func.func @transform_1(%arg0: i32) -> (i32, i32) {
    %c0_i32 = arith.constant 0 : i32
    %c0_i32_0 = arith.constant 0 : i32
    %c0_i32_1 = arith.constant 0 : i32
    return %c0_i32, %c0_i32_0 : i32, i32
  }
  func.func @transform_2(%arg0: i32) -> (i32, i32) {
    %c0_i32 = arith.constant 0 : i32
    %c0_i32_0 = arith.constant 0 : i32
    %c0_i32_1 = arith.constant 0 : i32
    return %c0_i32, %c0_i32_0 : i32, i32
  }
  func.func @transform_3(%arg0: i32) -> (i32, i32) {
    %c0_i32 = arith.constant 0 : i32
    %c0_i32_0 = arith.constant 0 : i32
    %c0_i32_1 = arith.constant 0 : i32
    return %c0_i32, %c0_i32_0 : i32, i32
  }
  func.func @transform_4(%arg0: i32) -> (i32, i32) {
    %c0_i32 = arith.constant 0 : i32
    %c0_i32_0 = arith.constant 0 : i32
    %c0_i32_1 = arith.constant 0 : i32
    return %c0_i32, %c0_i32_0 : i32, i32
  }
  func.func @transform_5(%arg0: i32) -> (i32, i32) {
    %c0_i32 = arith.constant 0 : i32
    %c0_i32_0 = arith.constant 0 : i32
    return %arg0, %c0_i32 : i32, i32
  }
}

</mosaic_0001>

<bundles_post_ra>
// kernel: mlp_forward.1
= control target key start
LH: loop header
LB: loop body
LE: loop exit
PB: predicated region body
PF: predicated region fallthrough
CT: control target
= control target key end

     0   :  { %v389_v7 = vmov 0.0   ;;  %s634_s0 = inlined_call_operand.vmem [shape: f32[8,128], index: 0, kind: input, shape index: {}]   ;;  %s635_s1 = inlined_call_operand.vmem [shape: f32[128,256], index: 1, kind: input, shape index: {}]   ;;  %s636_s2 = inlined_call_operand.vmem [shape: f32[1,256], index: 2, kind: input, shape index: {}]   ;;  %s637_s3 = inlined_call_operand.vmem [shape: f32[256,128], index: 3, kind: input, shape index: {}]   ;;  %s638_s4 = inlined_call_operand.vmem [shape: f32[1,128], index: 4, kind: input, shape index: {}]   ;;  %s639_s5 = inlined_call_operand.hbm [shape: f32[8,128], index: 5, kind: output, shape index: {}]  }
   0x1   :  { %v23_v0 = vld [vmem:[%s635_s1 + $0x8] sm:$0xff]  ;;  %v25_v1 = vld [vmem:[%s635_s1 + $0x18] sm:$0xff]  ;;  %v22_v2 = vld [vmem:[%s635_s1] sm:$0xff]  ;;  %130 = vmatprep.mubr.f32.mxu0 %v389_v7 }
   0x2   :  { %v299_v3 = vpack.c.bf16 %v25_v1, %v23_v0  ;;  %v24_v4 = vld [vmem:[%s635_s1 + $0x10] sm:$0xff]  ;;  %v27_v5 = vld [vmem:[%s635_s1 + $0x28] sm:$0xff]  ;;  %v29_v6 = vld [vmem:[%s635_s1 + $0x38] sm:$0xff] }
   0x3   :  { %v301_v8 = vpack.c.bf16 %v24_v4, %v22_v2  ;;  %v303_v9 = vpack.c.bf16 %v29_v6, %v27_v5  ;;  %v26_v10 = vld [vmem:[%s635_s1 + $0x20] sm:$0xff]  ;;  %v28_v11 = vld [vmem:[%s635_s1 + $0x30] sm:$0xff]  ;;  %v31_v12 = vld [vmem:[%s635_s1 + $0x48] sm:$0xff] }
   0x4   :  { %300 = vmatprep.subr.bf16.mxu0 %v299_v3  ;;  %v33_v13 = vld [vmem:[%s635_s1 + $0x58] sm:$0xff]  ;;  %v305_v14 = vpack.c.bf16 %v28_v11, %v26_v10  ;;  %v30_v16 = vld [vmem:[%s635_s1 + $0x40] sm:$0xff]  ;;  %v32_v17 = vld [vmem:[%s635_s1 + $0x50] sm:$0xff] }
   0x5   :  { %302 = vmatpush1.bf16.msra.mxu0 %v301_v8  ;;  %v307_v15 = vpack.c.bf16 %v33_v13, %v31_v12  ;;  %v35_v18 = vld [vmem:[%s635_s1 + $0x68] sm:$0xff]  ;;  %v37_v19 = vld [vmem:[%s635_s1 + $0x78] sm:$0xff]  ;;  %v309_v20 = vpack.c.bf16 %v32_v17, %v30_v16  ;;  %v34_v22 = vld [vmem:[%s635_s1 + $0x60] sm:$0xff] }
   0x6   :  { %304 = vmatprep.subr.bf16.mxu0 %v303_v9  ;;  %v311_v21 = vpack.c.bf16 %v37_v19, %v35_v18  ;;  %v36_v23 = vld [vmem:[%s635_s1 + $0x70] sm:$0xff]  ;;  %v39_v24 = vld [vmem:[%s635_s1 + $0x88] sm:$0xff]  ;;  %v41_v25 = vld [vmem:[%s635_s1 + $0x98] sm:$0xff] }
   0x7   :  { %v38_v26 = vld [vmem:[%s635_s1 + $0x80] sm:$0xff]  ;;  %v40_v27 = vld [vmem:[%s635_s1 + $0x90] sm:$0xff]  ;;  %v156_v29 = vld [vmem:[%s637_s3 + $0x88] sm:$0xff]  ;;  %v313_v31 = vpack.c.bf16 %v36_v23, %v34_v22  ;;  %v315_v36 = vpack.c.bf16 %v41_v25, %v39_v24 }
   0x8   :  { %v155_v28 = vld [vmem:[%s637_s3 + $0x80] sm:$0xff]  ;;  %v140_v33 = vld [vmem:[%s637_s3 + $0x8] sm:$0xff]  ;;  %v157_v34 = vld [vmem:[%s637_s3 + $0x90] sm:$0xff]  ;;  %v317_v46 = vpack.c.bf16 %v40_v27, %v38_v26 }
   0x9   :  { %306 = vmatpush1.bf16.msra.mxu0 %v305_v14  ;;  %v139_v30 = vld [vmem:[%s637_s3] sm:$0xff]  ;;  %v331_v32 = vpack.c.bf16 %v156_v29, %v155_v28  ;;  %v158_v35 = vld [vmem:[%s637_s3 + $0x98] sm:$0xff]  ;;  %v141_v39 = vld [vmem:[%s637_s3 + $0x10] sm:$0xff] }
   0xa   :  { %308 = vmatprep.subr.bf16.mxu0 %v307_v15  ;;  %v333_v37 = vpack.c.bf16 %v140_v33, %v139_v30  ;;  %v335_v38 = vpack.c.bf16 %v158_v35, %v157_v34  ;;  %v142_v40 = vld [vmem:[%s637_s3 + $0x18] sm:$0xff]  ;;  %v159_v41 = vld [vmem:[%s637_s3 + $0xa0] sm:$0xff]  ;;  %v43_v42 = vld [vmem:[%s635_s1 + $0xa8] sm:$0xff] }
   0xb   :  { %v45_v43 = vld [vmem:[%s635_s1 + $0xb8] sm:$0xff]  ;;  %332 = vmatprep.subr.bf16.mxu1 %v331_v32  ;;  %v160_v44 = vld [vmem:[%s637_s3 + $0xa8] sm:$0xff]  ;;  %v337_v45 = vpack.c.bf16 %v142_v40, %v141_v39  ;;  %v42_v47 = vld [vmem:[%s635_s1 + $0xa0] sm:$0xff] }
   0xc   :  { %334 = vmatpush3.bf16.msra.mxu1 %v333_v37  ;;  %v339_v48 = vpack.c.bf16 %v160_v44, %v159_v41  ;;  %v143_v49 = vld [vmem:[%s637_s3 + $0x20] sm:$0xff]  ;;  %v144_v50 = vld [vmem:[%s637_s3 + $0x28] sm:$0xff]  ;;  %v319_v51 = vpack.c.bf16 %v45_v43, %v43_v42  ;;  %v44_v52 = vld [vmem:[%s635_s1 + $0xb0] sm:$0xff] }
   0xd   :  { %310 = vmatpush1.bf16.msra.mxu0 %v309_v20  ;;  %336 = vmatprep.subr.bf16.mxu1 %v335_v38  ;;  %v161_v53 = vld [vmem:[%s637_s3 + $0xb0] sm:$0xff]  ;;  %v162_v54 = vld [vmem:[%s637_s3 + $0xb8] sm:$0xff]  ;;  %v47_v55 = vld [vmem:[%s635_s1 + $0xc8] sm:$0xff]  ;;  %v341_v58 = vpack.c.bf16 %v144_v50, %v143_v49  ;;  %v321_v59 = vpack.c.bf16 %v44_v52, %v42_v47 }
   0xe   :  { %312 = vmatprep.subr.bf16.mxu0 %v311_v21  ;;  %v49_v56 = vld [vmem:[%s635_s1 + $0xd8] sm:$0xff]  ;;  %v46_v57 = vld [vmem:[%s635_s1 + $0xc0] sm:$0xff]  ;;  %v343_v60 = vpack.c.bf16 %v162_v54, %v161_v53  ;;  %v145_v61 = vld [vmem:[%s637_s3 + $0x30] sm:$0xff] }
   0xf   :  { %v146_v62 = vld [vmem:[%s637_s3 + $0x38] sm:$0xff] }
  0x10   :  { %338 = vmatpush3.bf16.msra.mxu1 %v337_v45 }
  0x11   :  { %314 = vmatpush1.bf16.msra.mxu0 %v313_v31  ;;  %340 = vmatprep.subr.bf16.mxu1 %v339_v48 }
  0x12   :  { %316 = vmatprep.subr.bf16.mxu0 %v315_v36 }
  0x15   :  { %318 = vmatpush1.bf16.msra.mxu0 %v317_v46 }
  0x16   :  { %10 = vsyncpa [#allocation3], 0  ;;  %320 = vmatprep.subr.bf16.mxu0 %v319_v51  ;;  %v323_v63 = vpack.c.bf16 %v49_v56, %v47_v55  ;;  %v48_v0 = vld [vmem:[%s635_s1 + $0xd0] sm:$0xff]  ;;  %v163_v1 = vld [vmem:[%s637_s3 + $0xc0] sm:$0xff]  ;;  %342 = vmatpush3.bf16.msra.mxu1 %v341_v58  ;;  %v345_v5 = vpack.c.bf16 %v146_v62, %v145_v61  ;;  %v56_v34 = vlaneseq  ;;  %s390_s24 = smov [#allocation2]  }
  0x17   :  { %v164_v2 = vld [vmem:[%s637_s3 + $0xc8] sm:$0xff]  ;;  %v53_v4 = vld [vmem:[%s635_s1 + $0xf8] sm:$0xff]  ;;  %v325_v6 = vpack.c.bf16 %v48_v0, %v46_v57  ;;  %v50_v7 = vld [vmem:[%s635_s1 + $0xe0] sm:$0xff]  ;;  %344 = vmatprep.subr.bf16.mxu1 %v343_v60  ;;  %s255_s25 = sshll.u32 %s390_s24, 4  ;;  %s256_s25 = int_to_ptr.vmem [resolvable:$true] %s255_s25 }
  0x18   :  { %v51_v3 = vld [vmem:[%s635_s1 + $0xe8] sm:$0xff]  ;;  %v347_v8 = vpack.c.bf16 %v164_v2, %v163_v1  ;;  %v147_v9 = vld [vmem:[%s637_s3 + $0x40] sm:$0xff]  ;;  %v52_v12 = vld [vmem:[%s635_s1 + $0xf0] sm:$0xff]  ;;  %v57_v35 = vshrl.u32 %v56_v34, 7  ;;  %p370_p1 = scmp.lt.s32.totalorder %s256_s25, %s256_s25 }
  0x19   :  { %322 = vmatpush1.bf16.msra.mxu0 %v321_v59  ;;  %v148_v10 = vld [vmem:[%s637_s3 + $0x48] sm:$0xff]  ;;  %v327_v11 = vpack.c.bf16 %v53_v4, %v51_v3  ;;  %v165_v13 = vld [vmem:[%s637_s3 + $0xd0] sm:$0xff]  ;;  %v166_v14 = vld [vmem:[%s637_s3 + $0xd8] sm:$0xff]  ;;  %v329_v16 = vpack.c.bf16 %v52_v12, %v50_v7 }
  0x1a   :  { %324 = vmatprep.subr.bf16.mxu0 %v323_v63  ;;  %346 = vmatpush3.bf16.msra.mxu1 %v345_v5  ;;  %v349_v15 = vpack.c.bf16 %v148_v10, %v147_v9  ;;  %v351_v17 = vpack.c.bf16 %v166_v14, %v165_v13  ;;  %v149_v18 = vld [vmem:[%s637_s3 + $0x50] sm:$0xff]  ;;  %v150_v19 = vld [vmem:[%s637_s3 + $0x58] sm:$0xff]  ;;  %v167_v20 = vld [vmem:[%s637_s3 + $0xe0] sm:$0xff]  ;;  %v58_v36 = vsub.s32 0, %v57_v35  ;;  %v62_v38 = vsub.s32 1, %v57_v35 }
  0x1b   :  { %348 = vmatprep.subr.bf16.mxu1 %v347_v8  ;;  %v168_v21 = vld [vmem:[%s637_s3 + $0xe8] sm:$0xff]  ;;  %v353_v22 = vpack.c.bf16 %v150_v19, %v149_v18  ;;  %v21_v23 = vld [vmem:[%s634_s0] sm:$0xff]  ;;  %v169_v28 = vld [vmem:[%s637_s3 + $0xf0] sm:$0xff] }
  0x1c   :  { %v355_v24 = vpack.c.bf16 %v168_v21, %v167_v20  ;;  %v151_v25 = vld [vmem:[%s637_s3 + $0x60] sm:$0xff]  ;;  %v152_v26 = vld [vmem:[%s637_s3 + $0x68] sm:$0xff]  ;;  %v170_v29 = vld [vmem:[%s637_s3 + $0xf8] sm:$0xff] }
  0x1d   :  { %326 = vmatpush1.bf16.msra.mxu0 %v325_v6  ;;  %v357_v27 = vpack.c.bf16 %v152_v26, %v151_v25  ;;  %v359_v30 = vpack.c.bf16 %v170_v29, %v169_v28  ;;  %v153_v31 = vld [vmem:[%s637_s3 + $0x70] sm:$0xff]  ;;  %v154_v32 = vld [vmem:[%s637_s3 + $0x78] sm:$0xff]  ;;  %v54_v37 = vld [vmem:[%s636_s2] sm:$0x3]  ;;  %s365_s2 = scalar_lea.vmem %s256_s25, 128 }
  0x1e   :  { %328 = vmatprep.subr.bf16.mxu0 %v327_v11  ;;  %350 = vmatpush3.bf16.msra.mxu1 %v349_v15  ;;  %v361_v33 = vpack.c.bf16 %v154_v32, %v153_v31  ;;  %v59_v39 = vrot.slane %v54_v37, %v58_v36  ;;  %v63_v40 = vrot.slane %v54_v37, %v62_v38  ;;  %v263_v49 = vld [vmem:[%s638_s4] ss:$0 sm:$0xff]  ;;  %p366_p0 = scmp.ne.s32.totalorder %s256_s25, %s365_s2  ;;  %p371_p2 = scmp.lt.s32.totalorder %s365_s2, %s365_s2 }
  0x1f   :  { %352 = vmatprep.subr.bf16.mxu1 %v351_v17 }
  0x20   :  { %p372_p3 = por %p371_p2, %p370_p1 }
  0x21   :  { %330 = vmatpush1.bf16.msra.mxu0 %v329_v16 }
  0x22   :  { %354 = vmatpush3.bf16.msra.mxu1 %v353_v22  ;;  %p373_p4 = pnand %p372_p3, %p366_p0 }
  0x23   :  { %356 = vmatprep.subr.bf16.mxu1 %v355_v24 }
  0x24   :  { %131 = vmatmul.mubr.f32.vlgmr.msra.gmra.mrb[0].mxu0 %v21_v23 }
  0x26   :  { %358 = vmatpush3.bf16.msra.mxu1 %v357_v27 }
  0x27   :  { %360 = vmatprep.subr.bf16.mxu1 %v359_v30 }
  0x2a   :  { %362 = vmatpush3.bf16.msra.mxu1 %v361_v33 }
  0xf7   :  { %v132_v41 = vpop.f32.mrb[0].mxu0 }
  0xf8   :  { %v133_v42 = vadd.f32 %v132_v41, %v59_v39  ;;  %v134_v43 = vpop.f32.mrb[1].mxu0 }
  0xf9   :  { %v135_v44 = vadd.f32 %v134_v43, %v63_v40 }
  0xfa   :  { %v137_v46 = vmax.f32 %v133_v42, 0.0 }
  0xfb   :  { %v138_v45 = vmax.f32 %v135_v44, 0.0 }
  0xfd   :  { %242 = vmatprep.mubr.f32.mxu1 %v138_v45 }
  0xfe   :  { %243 = vmatmul.mubr.f32.vlgmr.msra.gmra.mrb[0].mxu1 %v137_v46 }
 0x1d1   :  { %v296_v47 = vpop.f32.mrb[0].mxu1 }
 0x1d2   :  { %v297_v48 = vpop.f32.mrb[1].mxu1 }
 0x1d3   :  { %v298_v50 = vadd.f32 %v297_v48, %v296_v47 }
 0x1d5   :  { %v245_v51 = vadd.f32 %v298_v50, %v263_v49 }
 0x1d7   :  { %248 = vst [vmem:[#allocation2] sm:$0xff] %v245_v51 }
 0x1d8   :  { %376 = shalt.err (!%p373_p4)
}
 0x1d9   :  { %s377_s28 = scalar_lea.hbm %s639_s5, 128 }
 0x1da   :  { %p378_p5 = scmp.ne.s32.totalorder %s639_s5, %s377_s28  ;;  %p381_p6 = scmp.lt.u32.totalorder %s377_s28, %s639_s5 }
 0x1dc   :  { %p383_p7 = pnand %p381_p6, %p378_p5 }
 0x1de   :  { %386 = shalt.err (!%p383_p7)
}
 0x1df   :  { %258 = dma.vmem_to_hbm [thread:$0]  %s256_s25, 128, %s639_s5, [#allocation3]  }
 0x1e0   :  { %387 = dma.done.wait [#allocation3], 128  }
 0x1e1   :  { %388 = vsyncadd [#allocation3], 4294967168 }
 0x1e2   :  { %262 = vsyncpa [#allocation3], 1 }

</bundles_post_ra>
